<compile_context>
chip_gen: v7x
topology: tpu7x:2x2x1
jax: 0.10.0
libtpu: 0.0.40
codegen_flags: <defaults>
</compile_context>

<pallas_src>
import jax
import jax.numpy as jnp
import numpy as np
from jax import lax
from jax.experimental import pallas as pl
from jax.experimental.pallas import tpu as pltpu


def _pick_batch_tile(B, W, max_tile_rows=4096):
    """Largest multiple-of-8 batch tile that divides B while keeping TB*W rows
    bounded (conservative enough for v7x's 64 MiB VMEM; raise on v5e/v6e if
    desired). Falls back to TB == B (single grid step, blocks = full arrays)."""
    best = None
    for tb in range(8, B + 1, 8):
        if B % tb == 0 and tb * W <= max_tile_rows:
            best = tb
    return best if best is not None else B


def wind_fault_cnn_forward(x, params, *, batch_tile=None, matmul_dtype=jnp.bfloat16):
    """x: (B, window_size, input_channels) float32 (the layout the PyTorch module
    receives BEFORE its internal permute). params in PyTorch shapes.
    Returns (B, num_classes) float32 softmax probabilities."""
    w1, b1, w2, b2, fc1_w, fc1_b, fc2_w, fc2_b = params
    B, W, Cin = (int(d) for d in x.shape)
    assert W % 2 == 0 and W >= 2, "supports even window_size (exact pairwise adaptive pooling)"
    C1, k = int(w1.shape[0]), int(w1.shape[2])
    C2 = int(w2.shape[0])
    F1 = int(fc1_w.shape[0])
    nc = int(fc2_w.shape[0])
    L2 = W // 2
    pad = (k - 1) // 2
    NCP = ((nc + 127) // 128) * 128          # lane-dense padded class dim

    TB = _pick_batch_tile(B, W) if batch_tile is None else int(batch_tile)
    assert B % TB == 0, "batch_tile must divide the batch size"
    assert TB == B or TB % 8 == 0, "batch_tile must be a multiple of 8 (or the full batch)"
    RW, RL = TB * W, TB * L2                 # per-tile row counts

    # ---- wrapper-only layout glue (tiny, traced once) ----
    x2 = x.reshape(B * W, Cin).astype(matmul_dtype)                      # rows = (b, t)
    w1t = jnp.transpose(w1, (2, 1, 0)).astype(matmul_dtype)              # (k, Cin, C1)
    w2t = jnp.transpose(w2, (2, 1, 0)).astype(matmul_dtype)              # (k, C1, C2)
    # PyTorch flatten of (C2, L2) indexes c*L2 + t; pre-split fc1 per spatial t.
    fw1t = jnp.transpose(fc1_w.reshape(F1, C2, L2), (2, 1, 0)).astype(matmul_dtype)  # (L2,C2,F1)
    fw2p = (jnp.zeros((F1, NCP), jnp.float32).at[:, :nc].set(fc2_w.T)).astype(matmul_dtype)
    fb2p = jnp.full((1, NCP), -1e30, jnp.float32).at[0, :nc].set(fc2_b)  # f32 (pads -> prob 0)
    b1r = b1.reshape(1, C1).astype(jnp.float32)
    b2r = b2.reshape(1, C2).astype(jnp.float32)
    fb1r = fc1_b.reshape(1, F1).astype(jnp.float32)

    def kernel(x_ref, w1_ref, b1_ref, w2_ref, b2_ref, fw1_ref, fb1_ref,
               fw2_ref, fb2_ref, out_ref, pad1_ref, hbuf_ref, pad2_ref, gbuf_ref):
        f32 = jnp.float32

        def conv_relu(act, pad_ref, w_ref, b_ref, n_rows, L):
            # Conv1d(padding='same') applied independently per length-L batch block,
            # as k accumulated (n_rows, Cin)@(Cin, Cout) MXU matmuls (no lane concat).
            cout = w_ref.shape[2]
            # Aligned halo-only zeroing + aligned (offset-8) active-row store.
            pad_ref[pl.ds(0, 8), :] = jnp.zeros((8, pad_ref.shape[1]), f32)
            pad_ref[pl.ds(8 + n_rows, 8), :] = jnp.zeros((8, pad_ref.shape[1]), f32)
            pad_ref[pl.ds(8, n_rows), :] = act
            # In-kernel row position t = row mod L (only needed when TB > 1).
            tpos = lax.broadcasted_iota(jnp.int32, (n_rows, 1), 0) % L
            acc = jnp.zeros((n_rows, cout), f32)
            for j in range(k):
                s = j - pad
                piece = act if s == 0 else pad_ref[pl.ds(8 + s, n_rows), :]
                if s != 0 and TB > 1:
                    ok = (tpos >= -s) if s < 0 else (tpos < L - s)
                    piece = jnp.where(ok, piece, 0.0)     # zero cross-block leakage
                acc = acc + jnp.dot(piece.astype(matmul_dtype), w_ref[j],
                                    preferred_element_type=f32)
            return jnp.maximum(acc + b_ref[...], 0.0)

        # ---- conv1 + ReLU over all tile rows ----
        h = conv_relu(x_ref[...].astype(f32), pad1_ref, w1_ref, b1_ref, RW, W)

        # ---- AdaptiveMaxPool1d W -> W//2: pairwise row max via strided reads ----
        hbuf_ref[...] = h
        hp = jnp.maximum(hbuf_ref[pl.ds(0, RL, stride=2), :],
                         hbuf_ref[pl.ds(1, RL, stride=2), :])            # (RL, C1)

        # ---- conv2 + ReLU ----
        g = conv_relu(hp, pad2_ref, w2_ref, b2_ref, RL, L2)

        # Second AdaptiveMaxPool1d(output=W//2) on a length-(W//2) input == identity.
        # TODO(synk): AdaptiveMaxPool1d with uneven bins not implemented; only the
        #             L == 2*O and L == O cases exercised by this module are handled.

        # ---- fc1: accumulated sum over spatial t of (TB, C2)@(C2, F1) matmuls ----
        gbuf_ref[...] = g
        acc1 = jnp.zeros((TB, F1), f32)
        for t in range(L2):
            gt = gbuf_ref[pl.ds(t, TB, stride=L2), :]                    # (TB, C2)
            acc1 = acc1 + jnp.dot(gt.astype(matmul_dtype), fw1_ref[t],
                                  preferred_element_type=f32)
        z1 = jnp.maximum(acc1 + fb1_ref[...], 0.0)

        # ---- fc2 (classes padded to one full 128-lane block) + softmax, all f32 ----
        z2 = jnp.dot(z1.astype(matmul_dtype), fw2_ref[...],
                     preferred_element_type=f32) + fb2_ref[...]
        zmax = jnp.max(z2, axis=-1, keepdims=True)
        e = jnp.exp(z2 - zmax)                       # padded logits -> exactly 0
        out_ref[...] = e / jnp.sum(e, axis=-1, keepdims=True)

    n_tiles = B // TB
    const3 = lambda b: (0, 0, 0)
    const2 = lambda b: (0, 0)
    grid_spec = pltpu.PrefetchScalarGridSpec(
        num_scalar_prefetch=0,
        grid=(n_tiles,),
        in_specs=[
            pl.BlockSpec((RW, Cin), lambda b: (b, 0)),   # x stream: pipelined per batch tile
            pl.BlockSpec((k, Cin, C1), const3),          # weights/biases: constant index_map,
            pl.BlockSpec((1, C1), const2),               # DMA'd once, stay resident in VMEM
            pl.BlockSpec((k, C1, C2), const3),
            pl.BlockSpec((1, C2), const2),
            pl.BlockSpec((L2, C2, F1), const3),
            pl.BlockSpec((1, F1), const2),
            pl.BlockSpec((F1, NCP), const2),
            pl.BlockSpec((1, NCP), const2),
        ],
        out_specs=pl.BlockSpec((TB, NCP), lambda b: (b, 0)),
        scratch_shapes=[
            pltpu.VMEM((RW + 16, Cin), jnp.float32),     # conv1 zero-halo buffer
            pltpu.VMEM((RW, C1), jnp.float32),           # conv1 output (pooling strided reads)
            pltpu.VMEM((RL + 16, C1), jnp.float32),      # conv2 zero-halo buffer
            pltpu.VMEM((RL, C2), jnp.float32),           # conv2 output (fc1 strided reads)
        ],
    )

    flops = 2 * B * (W * k * Cin * C1 + L2 * k * C1 * C2 + L2 * C2 * F1 + F1 * NCP)
    bytes_accessed = int(
        x2.size * x2.dtype.itemsize + w1t.size * w1t.dtype.itemsize
        + w2t.size * w2t.dtype.itemsize + fw1t.size * fw1t.dtype.itemsize
        + fw2p.size * fw2p.dtype.itemsize
        + 4 * (C1 + C2 + F1 + NCP + B * NCP))

    out_padded = pl.pallas_call(
        kernel,
        out_shape=jax.ShapeDtypeStruct((B, NCP), jnp.float32),
        grid_spec=grid_spec,
        compiler_params=pltpu.CompilerParams(
            dimension_semantics=("parallel",),           # batch tiles -> megacore on v7x
            vmem_limit_bytes=32 * 1024 * 1024),
        cost_estimate=pl.CostEstimate(flops=flops, transcendentals=B * NCP,
                                      bytes_accessed=bytes_accessed),
    )(x2, w1t, b1r, w2t, b2r, fw1t, fb1r, fw2p, fb2p)
    return out_padded[:, :nc]


# ---------------- pure-JAX reference with exact PyTorch semantics ----------------
def torch_style_reference(x, params, window_size):
    w1, b1, w2, b2, fc1_w, fc1_b, fc2_w, fc2_b = params

    def conv1d_same(x_ncl, w, b):
        O, C, k = w.shape
        pad_l = (k - 1) // 2
        pad_r = k - 1 - pad_l
        L = x_ncl.shape[2]
        xp = jnp.pad(x_ncl, ((0, 0), (0, 0), (pad_l, pad_r)))
        out = jnp.zeros((x_ncl.shape[0], O, L), jnp.float32)
        for j in range(k):
            out = out + jnp.einsum('bcl,oc->bol', xp[:, :, j:j + L], w[:, :, j])
        return out + b[None, :, None]

    def adaptive_max_pool(x_ncl, out_size):
        L = x_ncl.shape[2]
        if L == out_size:
            return x_ncl
        assert L == 2 * out_size
        return x_ncl.reshape(x_ncl.shape[0], x_ncl.shape[1], out_size, 2).max(axis=3)

    xt = jnp.transpose(x, (0, 2, 1))                                   # (B, Cin, W)
    h = adaptive_max_pool(jax.nn.relu(conv1d_same(xt, w1, b1)), window_size // 2)
    g = adaptive_max_pool(jax.nn.relu(conv1d_same(h, w2, b2)), window_size // 2)
    flat = g.reshape(g.shape[0], -1)
    z1 = jax.nn.relu(flat @ fc1_w.T + fc1_b)
    z2 = z1 @ fc2_w.T + fc2_b
    return jax.nn.softmax(z2, axis=1)


if __name__ == "__main__":
    B, W, Cin, NC = 16, 8, 4, 3          # batch, window_size, input_channels, num_classes
    k = min(3, W)

    key = jax.random.PRNGKey(0)
    keys = jax.random.split(key, 9)
    w1 = jax.random.normal(keys[0], (16, Cin, k), jnp.float32) * 0.1
    b1 = jax.random.normal(keys[1], (16,), jnp.float32) * 0.1
    w2 = jax.random.normal(keys[2], (32, 16, k), jnp.float32) * 0.1
    b2 = jax.random.normal(keys[3], (32,), jnp.float32) * 0.1
    fc1_w = jax.random.normal(keys[4], (64, 32 * (W // 2)), jnp.float32) * 0.1
    fc1_b = jax.random.normal(keys[5], (64,), jnp.float32) * 0.1
    fc2_w = jax.random.normal(keys[6], (NC, 64), jnp.float32) * 0.1
    fc2_b = jax.random.normal(keys[7], (NC,), jnp.float32) * 0.1
    x = jax.random.normal(keys[8], (B, W, Cin), jnp.float32)

    params = (w1, b1, w2, b2, fc1_w, fc1_b, fc2_w, fc2_b)

    # batch_tile=8 -> grid=(2,), exercising the batch pipeline / parallel grid axis.
    out = jax.block_until_ready(wind_fault_cnn_forward(x, params, batch_tile=8))
    ref = jax.block_until_ready(torch_style_reference(x, params, W))

    # bf16 matmul operands -> compare against the f32 reference with bf16-level tolerance.
    np.testing.assert_allclose(np.asarray(out), np.asarray(ref), rtol=3e-2, atol=3e-3)
    assert np.allclose(np.asarray(out).sum(axis=1), 1.0, atol=1e-5)
    print("KERNEL_OK")
</pallas_src>

<mosaic_0001>
module attributes {stable_mosaic.version = 11 : i64} {
  func.func @kernel(%arg0: i32, %arg1: memref<64x4xbf16, #tpu.memory_space<vmem>>, %arg2: memref<3x4x16xbf16, #tpu.memory_space<vmem>>, %arg3: memref<1x16xf32, #tpu.memory_space<vmem>>, %arg4: memref<3x16x32xbf16, #tpu.memory_space<vmem>>, %arg5: memref<1x32xf32, #tpu.memory_space<vmem>>, %arg6: memref<4x32x64xbf16, #tpu.memory_space<vmem>>, %arg7: memref<1x64xf32, #tpu.memory_space<vmem>>, %arg8: memref<64x128xbf16, #tpu.memory_space<vmem>>, %arg9: memref<1x128xf32, #tpu.memory_space<vmem>>, %arg10: memref<8x128xf32, #tpu.memory_space<vmem>>, %arg11: memref<80x4xf32, #tpu.memory_space<vmem>>, %arg12: memref<64x16xf32, #tpu.memory_space<vmem>>, %arg13: memref<48x16xf32, #tpu.memory_space<vmem>>, %arg14: memref<32x32xf32, #tpu.memory_space<vmem>>) attributes {dimension_semantics = [#tpu.dimension_semantics<parallel>], iteration_bounds = array<i64: 2>, scalar_prefetch = 0 : i64, scratch_operands = 4 : i64, tpu.core_type = #tpu.core_type<tc>, window_params = [{transform_indices = @transform_0, window_bounds = array<i64: 64, 4>}, {pipeline_mode = #tpu.pipeline_mode<synchronous>, transform_indices = @transform_1, window_bounds = array<i64: 3, 4, 16>}, {pipeline_mode = #tpu.pipeline_mode<synchronous>, transform_indices = @transform_2, window_bounds = array<i64: 1, 16>}, {pipeline_mode = #tpu.pipeline_mode<synchronous>, transform_indices = @transform_3, window_bounds = array<i64: 3, 16, 32>}, {pipeline_mode = #tpu.pipeline_mode<synchronous>, transform_indices = @transform_4, window_bounds = array<i64: 1, 32>}, {pipeline_mode = #tpu.pipeline_mode<synchronous>, transform_indices = @transform_5, window_bounds = array<i64: 4, 32, 64>}, {pipeline_mode = #tpu.pipeline_mode<synchronous>, transform_indices = @transform_6, window_bounds = array<i64: 1, 64>}, {pipeline_mode = #tpu.pipeline_mode<synchronous>, transform_indices = @transform_7, window_bounds = array<i64: 64, 128>}, {pipeline_mode = #tpu.pipeline_mode<synchronous>, transform_indices = @transform_8, window_bounds = array<i64: 1, 128>}, {transform_indices = @transform_9, window_bounds = array<i64: 8, 128>}]} {
    %c0 = arith.constant 0 : index
    %c0_0 = arith.constant 0 : index
    %0 = vector.load %arg1[%c0, %c0_0] : memref<64x4xbf16, #tpu.memory_space<vmem>>, vector<64x4xbf16>
    %1 = arith.extf %0 : vector<64x4xbf16> to vector<64x4xf32>
    %cst = arith.constant 0.000000e+00 : f32
    %2 = vector.broadcast %cst : f32 to vector<8x4xf32>
    %c0_1 = arith.constant 0 : index
    %c0_2 = arith.constant 0 : index
    %3 = vector.load %arg11[%c0_1, %c0_2] : memref<80x4xf32, #tpu.memory_space<vmem>>, vector<8x4xf32>
    tpu.vector_store %arg11[%c0_1, %c0_2], %2 {strides = array<i32>} : memref<80x4xf32, #tpu.memory_space<vmem>>, vector<8x4xf32>,
    %cst_3 = arith.constant 0.000000e+00 : f32
    %4 = vector.broadcast %cst_3 : f32 to vector<8x4xf32>
    %c72 = arith.constant 72 : index
    %c0_4 = arith.constant 0 : index
    %5 = vector.load %arg11[%c72, %c0_4] : memref<80x4xf32, #tpu.memory_space<vmem>>, vector<8x4xf32>
    tpu.vector_store %arg11[%c72, %c0_4], %4 {strides = array<i32>} : memref<80x4xf32, #tpu.memory_space<vmem>>, vector<8x4xf32>,
    %c8 = arith.constant 8 : index
    %c0_5 = arith.constant 0 : index
    %6 = vector.load %arg11[%c8, %c0_5] : memref<80x4xf32, #tpu.memory_space<vmem>>, vector<64x4xf32>
    tpu.vector_store %arg11[%c8, %c0_5], %1 {strides = array<i32>} : memref<80x4xf32, #tpu.memory_space<vmem>>, vector<64x4xf32>,
    %7 = tpu.iota {dimensions = array<i32: 0>} : vector<64x1xi32>
    %c8_i32 = arith.constant 8 : i32
    %c0_i32 = arith.constant 0 : i32
    %8 = arith.cmpi eq, %c8_i32, %c0_i32 : i32
    %c1_i32 = arith.constant 1 : i32
    %9 = arith.select %8, %c1_i32, %c8_i32 : i32
    %10 = vector.broadcast %9 : i32 to vector<64x1xi32>
    %11 = arith.remsi %7, %10 : vector<64x1xi32>
    %c0_i32_6 = arith.constant 0 : i32
    %12 = vector.broadcast %c0_i32_6 : i32 to vector<64x1xi32>
    %13 = arith.cmpi ne, %11, %12 : vector<64x1xi32>
    %c0_i32_7 = arith.constant 0 : i32
    %14 = vector.broadcast %c0_i32_7 : i32 to vector<64x1xi32>
    %15 = arith.cmpi slt, %11, %14 : vector<64x1xi32>
    %c0_i32_8 = arith.constant 0 : i32
    %16 = arith.cmpi slt, %9, %c0_i32_8 : i32
    %17 = vector.broadcast %16 : i1 to vector<64x1xi1>
    %18 = vector.broadcast %17 : vector<64x1xi1> to vector<64x1xi1>
    %19 = arith.xori %15, %18 : vector<64x1xi1>
    %20 = arith.andi %19, %13 : vector<64x1xi1>
    %21 = vector.broadcast %9 : i32 to vector<64x1xi32>
    %22 = arith.addi %11, %21 : vector<64x1xi32>
    %23 = arith.select %20, %22, %11 : vector<64x1xi1>, vector<64x1xi32>
    %cst_9 = arith.constant 0.000000e+00 : f32
    %24 = vector.broadcast %cst_9 : f32 to vector<64x16xf32>
    %c7 = arith.constant 7 : index
    %c0_10 = arith.constant 0 : index
    %25 = vector.load %arg11[%c7, %c0_10] : memref<80x4xf32, #tpu.memory_space<vmem>>, vector<64x4xf32>
    %c1_i32_11 = arith.constant 1 : i32
    %26 = vector.broadcast %c1_i32_11 : i32 to vector<64x1xi32>
    %27 = arith.cmpi sge, %23, %26 : vector<64x1xi32>
    %cst_12 = arith.constant 0.000000e+00 : f32
    %28 = vector.shape_cast %27 : vector<64x1xi1> to vector<64x1xi1>
    %29 = vector.broadcast %28 : vector<64x1xi1> to vector<64x4xi1>
    %30 = vector.broadcast %cst_12 : f32 to vector<64x4xf32>
    %31 = arith.select %29, %25, %30 : vector<64x4xi1>, vector<64x4xf32>
    %32 = arith.truncf %31 : vector<64x4xf32> to vector<64x4xbf16>
    %c0_13 = arith.constant 0 : index
    %c0_14 = arith.constant 0 : index
    %c0_15 = arith.constant 0 : index
    %33 = vector.load %arg2[%c0_13, %c0_14, %c0_15] : memref<3x4x16xbf16, #tpu.memory_space<vmem>>, vector<1x4x16xbf16>
    %34 = vector.shape_cast %33 : vector<1x4x16xbf16> to vector<4x16xbf16>
    %cst_16 = arith.constant dense<0.000000e+00> : vector<64x16xf32>
    %35 = tpu.matmul %32, %34, %cst_16 {dimension_numbers = #tpu.dot_dimension_numbers<[1], [0], [0], [1], [0, 0, 1, 1], [], []>} : vector<64x4xbf16>, vector<4x16xbf16>, vector<64x16xf32> -> vector<64x16xf32>
    %36 = arith.addf %24, %35 : vector<64x16xf32>
    %37 = arith.truncf %1 : vector<64x4xf32> to vector<64x4xbf16>
    %c1 = arith.constant 1 : index
    %c0_17 = arith.constant 0 : index
    %c0_18 = arith.constant 0 : index
    %38 = vector.load %arg2[%c1, %c0_17, %c0_18] : memref<3x4x16xbf16, #tpu.memory_space<vmem>>, vector<1x4x16xbf16>
    %39 = vector.shape_cast %38 : vector<1x4x16xbf16> to vector<4x16xbf16>
    %cst_19 = arith.constant dense<0.000000e+00> : vector<64x16xf32>
    %40 = tpu.matmul %37, %39, %cst_19 {dimension_numbers = #tpu.dot_dimension_numbers<[1], [0], [0], [1], [0, 0, 1, 1], [], []>} : vector<64x4xbf16>, vector<4x16xbf16>, vector<64x16xf32> -> vector<64x16xf32>
    %41 = arith.addf %36, %40 : vector<64x16xf32>
    %c9 = arith.constant 9 : index
    %c0_20 = arith.constant 0 : index
    %42 = vector.load %arg11[%c9, %c0_20] : memref<80x4xf32, #tpu.memory_space<vmem>>, vector<64x4xf32>
    %c7_i32 = arith.constant 7 : i32
    %43 = vector.broadcast %c7_i32 : i32 to vector<64x1xi32>
    %44 = arith.cmpi slt, %23, %43 : vector<64x1xi32>
    %cst_21 = arith.constant 0.000000e+00 : f32
    %45 = vector.shape_cast %44 : vector<64x1xi1> to vector<64x1xi1>
    %46 = vector.broadcast %45 : vector<64x1xi1> to vector<64x4xi1>
    %47 = vector.broadcast %cst_21 : f32 to vector<64x4xf32>
    %48 = arith.select %46, %42, %47 : vector<64x4xi1>, vector<64x4xf32>
    %49 = arith.truncf %48 : vector<64x4xf32> to vector<64x4xbf16>
    %c2 = arith.constant 2 : index
    %c0_22 = arith.constant 0 : index
    %c0_23 = arith.constant 0 : index
    %50 = vector.load %arg2[%c2, %c0_22, %c0_23] : memref<3x4x16xbf16, #tpu.memory_space<vmem>>, vector<1x4x16xbf16>
    %51 = vector.shape_cast %50 : vector<1x4x16xbf16> to vector<4x16xbf16>
    %cst_24 = arith.constant dense<0.000000e+00> : vector<64x16xf32>
    %52 = tpu.matmul %49, %51, %cst_24 {dimension_numbers = #tpu.dot_dimension_numbers<[1], [0], [0], [1], [0, 0, 1, 1], [], []>} : vector<64x4xbf16>, vector<4x16xbf16>, vector<64x16xf32> -> vector<64x16xf32>
    %53 = arith.addf %41, %52 : vector<64x16xf32>
    %c0_25 = arith.constant 0 : index
    %c0_26 = arith.constant 0 : index
    %54 = vector.load %arg3[%c0_25, %c0_26] : memref<1x16xf32, #tpu.memory_space<vmem>>, vector<1x16xf32>
    %55 = vector.broadcast %54 : vector<1x16xf32> to vector<64x16xf32>
    %56 = arith.addf %53, %55 : vector<64x16xf32>
    %cst_27 = arith.constant 0.000000e+00 : f32
    %57 = vector.broadcast %cst_27 : f32 to vector<64x16xf32>
    %58 = arith.maximumf %56, %57 : vector<64x16xf32>
    %c0_28 = arith.constant 0 : index
    %c0_29 = arith.constant 0 : index
    %59 = vector.load %arg12[%c0_28, %c0_29] : memref<64x16xf32, #tpu.memory_space<vmem>>, vector<64x16xf32>
    tpu.vector_store %arg12[%c0_28, %c0_29], %58 {strides = array<i32>} : memref<64x16xf32, #tpu.memory_space<vmem>>, vector<64x16xf32>,
    %c0_30 = arith.constant 0 : index
    %c0_31 = arith.constant 0 : index
    %60 = tpu.strided_load %arg12[%c0_30, %c0_31] {strides = array<i32: 2, 1>} : memref<64x16xf32, #tpu.memory_space<vmem>>, vector<32x16xf32>
    %c1_32 = arith.constant 1 : index
    %c0_33 = arith.constant 0 : index
    %61 = tpu.strided_load %arg12[%c1_32, %c0_33] {strides = array<i32: 2, 1>} : memref<64x16xf32, #tpu.memory_space<vmem>>, vector<32x16xf32>
    %62 = arith.maximumf %60, %61 : vector<32x16xf32>
    %cst_34 = arith.constant 0.000000e+00 : f32
    %63 = vector.broadcast %cst_34 : f32 to vector<8x16xf32>
    %c0_35 = arith.constant 0 : index
    %c0_36 = arith.constant 0 : index
    %64 = vector.load %arg13[%c0_35, %c0_36] : memref<48x16xf32, #tpu.memory_space<vmem>>, vector<8x16xf32>
    tpu.vector_store %arg13[%c0_35, %c0_36], %63 {strides = array<i32>} : memref<48x16xf32, #tpu.memory_space<vmem>>, vector<8x16xf32>,
    %cst_37 = arith.constant 0.000000e+00 : f32
    %65 = vector.broadcast %cst_37 : f32 to vector<8x16xf32>
    %c40 = arith.constant 40 : index
    %c0_38 = arith.constant 0 : index
    %66 = vector.load %arg13[%c40, %c0_38] : memref<48x16xf32, #tpu.memory_space<vmem>>, vector<8x16xf32>
    tpu.vector_store %arg13[%c40, %c0_38], %65 {strides = array<i32>} : memref<48x16xf32, #tpu.memory_space<vmem>>, vector<8x16xf32>,
    %c8_39 = arith.constant 8 : index
    %c0_40 = arith.constant 0 : index
    %67 = vector.load %arg13[%c8_39, %c0_40] : memref<48x16xf32, #tpu.memory_space<vmem>>, vector<32x16xf32>
    tpu.vector_store %arg13[%c8_39, %c0_40], %62 {strides = array<i32>} : memref<48x16xf32, #tpu.memory_space<vmem>>, vector<32x16xf32>,
    %68 = tpu.iota {dimensions = array<i32: 0>} : vector<32x1xi32>
    %c4_i32 = arith.constant 4 : i32
    %c0_i32_41 = arith.constant 0 : i32
    %69 = arith.cmpi eq, %c4_i32, %c0_i32_41 : i32
    %c1_i32_42 = arith.constant 1 : i32
    %70 = arith.select %69, %c1_i32_42, %c4_i32 : i32
    %71 = vector.broadcast %70 : i32 to vector<32x1xi32>
    %72 = arith.remsi %68, %71 : vector<32x1xi32>
    %c0_i32_43 = arith.constant 0 : i32
    %73 = vector.broadcast %c0_i32_43 : i32 to vector<32x1xi32>
    %74 = arith.cmpi ne, %72, %73 : vector<32x1xi32>
    %c0_i32_44 = arith.constant 0 : i32
    %75 = vector.broadcast %c0_i32_44 : i32 to vector<32x1xi32>
    %76 = arith.cmpi slt, %72, %75 : vector<32x1xi32>
    %c0_i32_45 = arith.constant 0 : i32
    %77 = arith.cmpi slt, %70, %c0_i32_45 : i32
    %78 = vector.broadcast %77 : i1 to vector<32x1xi1>
    %79 = vector.broadcast %78 : vector<32x1xi1> to vector<32x1xi1>
    %80 = arith.xori %76, %79 : vector<32x1xi1>
    %81 = arith.andi %80, %74 : vector<32x1xi1>
    %82 = vector.broadcast %70 : i32 to vector<32x1xi32>
    %83 = arith.addi %72, %82 : vector<32x1xi32>
    %84 = arith.select %81, %83, %72 : vector<32x1xi1>, vector<32x1xi32>
    %cst_46 = arith.constant 0.000000e+00 : f32
    %85 = vector.broadcast %cst_46 : f32 to vector<32x32xf32>
    %c7_47 = arith.constant 7 : index
    %c0_48 = arith.constant 0 : index
    %86 = vector.load %arg13[%c7_47, %c0_48] : memref<48x16xf32, #tpu.memory_space<vmem>>, vector<32x16xf32>
    %c1_i32_49 = arith.constant 1 : i32
    %87 = vector.broadcast %c1_i32_49 : i32 to vector<32x1xi32>
    %88 = arith.cmpi sge, %84, %87 : vector<32x1xi32>
    %cst_50 = arith.constant 0.000000e+00 : f32
    %89 = vector.shape_cast %88 : vector<32x1xi1> to vector<32x1xi1>
    %90 = vector.broadcast %89 : vector<32x1xi1> to vector<32x16xi1>
    %91 = vector.broadcast %cst_50 : f32 to vector<32x16xf32>
    %92 = arith.select %90, %86, %91 : vector<32x16xi1>, vector<32x16xf32>
    %93 = arith.truncf %92 : vector<32x16xf32> to vector<32x16xbf16>
    %c0_51 = arith.constant 0 : index
    %c0_52 = arith.constant 0 : index
    %c0_53 = arith.constant 0 : index
    %94 = vector.load %arg4[%c0_51, %c0_52, %c0_53] : memref<3x16x32xbf16, #tpu.memory_space<vmem>>, vector<1x16x32xbf16>
    %95 = vector.shape_cast %94 : vector<1x16x32xbf16> to vector<16x32xbf16>
    %cst_54 = arith.constant dense<0.000000e+00> : vector<32x32xf32>
    %96 = tpu.matmul %93, %95, %cst_54 {dimension_numbers = #tpu.dot_dimension_numbers<[1], [0], [0], [1], [0, 0, 1, 1], [], []>} : vector<32x16xbf16>, vector<16x32xbf16>, vector<32x32xf32> -> vector<32x32xf32>
    %97 = arith.addf %85, %96 : vector<32x32xf32>
    %98 = arith.truncf %62 : vector<32x16xf32> to vector<32x16xbf16>
    %c1_55 = arith.constant 1 : index
    %c0_56 = arith.constant 0 : index
    %c0_57 = arith.constant 0 : index
    %99 = vector.load %arg4[%c1_55, %c0_56, %c0_57] : memref<3x16x32xbf16, #tpu.memory_space<vmem>>, vector<1x16x32xbf16>
    %100 = vector.shape_cast %99 : vector<1x16x32xbf16> to vector<16x32xbf16>
    %cst_58 = arith.constant dense<0.000000e+00> : vector<32x32xf32>
    %101 = tpu.matmul %98, %100, %cst_58 {dimension_numbers = #tpu.dot_dimension_numbers<[1], [0], [0], [1], [0, 0, 1, 1], [], []>} : vector<32x16xbf16>, vector<16x32xbf16>, vector<32x32xf32> -> vector<32x32xf32>
    %102 = arith.addf %97, %101 : vector<32x32xf32>
    %c9_59 = arith.constant 9 : index
    %c0_60 = arith.constant 0 : index
    %103 = vector.load %arg13[%c9_59, %c0_60] : memref<48x16xf32, #tpu.memory_space<vmem>>, vector<32x16xf32>
    %c3_i32 = arith.constant 3 : i32
    %104 = vector.broadcast %c3_i32 : i32 to vector<32x1xi32>
    %105 = arith.cmpi slt, %84, %104 : vector<32x1xi32>
    %cst_61 = arith.constant 0.000000e+00 : f32
    %106 = vector.shape_cast %105 : vector<32x1xi1> to vector<32x1xi1>
    %107 = vector.broadcast %106 : vector<32x1xi1> to vector<32x16xi1>
    %108 = vector.broadcast %cst_61 : f32 to vector<32x16xf32>
    %109 = arith.select %107, %103, %108 : vector<32x16xi1>, vector<32x16xf32>
    %110 = arith.truncf %109 : vector<32x16xf32> to vector<32x16xbf16>
    %c2_62 = arith.constant 2 : index
    %c0_63 = arith.constant 0 : index
    %c0_64 = arith.constant 0 : index
    %111 = vector.load %arg4[%c2_62, %c0_63, %c0_64] : memref<3x16x32xbf16, #tpu.memory_space<vmem>>, vector<1x16x32xbf16>
    %112 = vector.shape_cast %111 : vector<1x16x32xbf16> to vector<16x32xbf16>
    %cst_65 = arith.constant dense<0.000000e+00> : vector<32x32xf32>
    %113 = tpu.matmul %110, %112, %cst_65 {dimension_numbers = #tpu.dot_dimension_numbers<[1], [0], [0], [1], [0, 0, 1, 1], [], []>} : vector<32x16xbf16>, vector<16x32xbf16>, vector<32x32xf32> -> vector<32x32xf32>
    %114 = arith.addf %102, %113 : vector<32x32xf32>
    %c0_66 = arith.constant 0 : index
    %c0_67 = arith.constant 0 : index
    %115 = vector.load %arg5[%c0_66, %c0_67] : memref<1x32xf32, #tpu.memory_space<vmem>>, vector<1x32xf32>
    %116 = vector.broadcast %115 : vector<1x32xf32> to vector<32x32xf32>
    %117 = arith.addf %114, %116 : vector<32x32xf32>
    %cst_68 = arith.constant 0.000000e+00 : f32
    %118 = vector.broadcast %cst_68 : f32 to vector<32x32xf32>
    %119 = arith.maximumf %117, %118 : vector<32x32xf32>
    %c0_69 = arith.constant 0 : index
    %c0_70 = arith.constant 0 : index
    %120 = vector.load %arg14[%c0_69, %c0_70] : memref<32x32xf32, #tpu.memory_space<vmem>>, vector<32x32xf32>
    tpu.vector_store %arg14[%c0_69, %c0_70], %119 {strides = array<i32>} : memref<32x32xf32, #tpu.memory_space<vmem>>, vector<32x32xf32>,
    %cst_71 = arith.constant 0.000000e+00 : f32
    %121 = vector.broadcast %cst_71 : f32 to vector<8x64xf32>
    %c0_72 = arith.constant 0 : index
    %c0_73 = arith.constant 0 : index
    %122 = tpu.strided_load %arg14[%c0_72, %c0_73] {strides = array<i32: 4, 1>} : memref<32x32xf32, #tpu.memory_space<vmem>>, vector<8x32xf32>
    %123 = arith.truncf %122 : vector<8x32xf32> to vector<8x32xbf16>
    %c0_74 = arith.constant 0 : index
    %c0_75 = arith.constant 0 : index
    %c0_76 = arith.constant 0 : index
    %124 = vector.load %arg6[%c0_74, %c0_75, %c0_76] : memref<4x32x64xbf16, #tpu.memory_space<vmem>>, vector<1x32x64xbf16>
    %125 = vector.shape_cast %124 : vector<1x32x64xbf16> to vector<32x64xbf16>
    %cst_77 = arith.constant dense<0.000000e+00> : vector<8x64xf32>
    %126 = tpu.matmul %123, %125, %cst_77 {dimension_numbers = #tpu.dot_dimension_numbers<[1], [0], [0], [1], [0, 0, 1, 1], [], []>} : vector<8x32xbf16>, vector<32x64xbf16>, vector<8x64xf32> -> vector<8x64xf32>
    %127 = arith.addf %121, %126 : vector<8x64xf32>
    %c1_78 = arith.constant 1 : index
    %c0_79 = arith.constant 0 : index
    %128 = tpu.strided_load %arg14[%c1_78, %c0_79] {strides = array<i32: 4, 1>} : memref<32x32xf32, #tpu.memory_space<vmem>>, vector<8x32xf32>
    %129 = arith.truncf %128 : vector<8x32xf32> to vector<8x32xbf16>
    %c1_80 = arith.constant 1 : index
    %c0_81 = arith.constant 0 : index
    %c0_82 = arith.constant 0 : index
    %130 = vector.load %arg6[%c1_80, %c0_81, %c0_82] : memref<4x32x64xbf16, #tpu.memory_space<vmem>>, vector<1x32x64xbf16>
    %131 = vector.shape_cast %130 : vector<1x32x64xbf16> to vector<32x64xbf16>
    %cst_83 = arith.constant dense<0.000000e+00> : vector<8x64xf32>
    %132 = tpu.matmul %129, %131, %cst_83 {dimension_numbers = #tpu.dot_dimension_numbers<[1], [0], [0], [1], [0, 0, 1, 1], [], []>} : vector<8x32xbf16>, vector<32x64xbf16>, vector<8x64xf32> -> vector<8x64xf32>
    %133 = arith.addf %127, %132 : vector<8x64xf32>
    %c2_84 = arith.constant 2 : index
    %c0_85 = arith.constant 0 : index
    %134 = tpu.strided_load %arg14[%c2_84, %c0_85] {strides = array<i32: 4, 1>} : memref<32x32xf32, #tpu.memory_space<vmem>>, vector<8x32xf32>
    %135 = arith.truncf %134 : vector<8x32xf32> to vector<8x32xbf16>
    %c2_86 = arith.constant 2 : index
    %c0_87 = arith.constant 0 : index
    %c0_88 = arith.constant 0 : index
    %136 = vector.load %arg6[%c2_86, %c0_87, %c0_88] : memref<4x32x64xbf16, #tpu.memory_space<vmem>>, vector<1x32x64xbf16>
    %137 = vector.shape_cast %136 : vector<1x32x64xbf16> to vector<32x64xbf16>
    %cst_89 = arith.constant dense<0.000000e+00> : vector<8x64xf32>
    %138 = tpu.matmul %135, %137, %cst_89 {dimension_numbers = #tpu.dot_dimension_numbers<[1], [0], [0], [1], [0, 0, 1, 1], [], []>} : vector<8x32xbf16>, vector<32x64xbf16>, vector<8x64xf32> -> vector<8x64xf32>
    %139 = arith.addf %133, %138 : vector<8x64xf32>
    %c3 = arith.constant 3 : index
    %c0_90 = arith.constant 0 : index
    %140 = tpu.strided_load %arg14[%c3, %c0_90] {strides = array<i32: 4, 1>} : memref<32x32xf32, #tpu.memory_space<vmem>>, vector<8x32xf32>
    %141 = arith.truncf %140 : vector<8x32xf32> to vector<8x32xbf16>
    %c3_91 = arith.constant 3 : index
    %c0_92 = arith.constant 0 : index
    %c0_93 = arith.constant 0 : index
    %142 = vector.load %arg6[%c3_91, %c0_92, %c0_93] : memref<4x32x64xbf16, #tpu.memory_space<vmem>>, vector<1x32x64xbf16>
    %143 = vector.shape_cast %142 : vector<1x32x64xbf16> to vector<32x64xbf16>
    %cst_94 = arith.constant dense<0.000000e+00> : vector<8x64xf32>
    %144 = tpu.matmul %141, %143, %cst_94 {dimension_numbers = #tpu.dot_dimension_numbers<[1], [0], [0], [1], [0, 0, 1, 1], [], []>} : vector<8x32xbf16>, vector<32x64xbf16>, vector<8x64xf32> -> vector<8x64xf32>
    %145 = arith.addf %139, %144 : vector<8x64xf32>
    %c0_95 = arith.constant 0 : index
    %c0_96 = arith.constant 0 : index
    %146 = vector.load %arg7[%c0_95, %c0_96] : memref<1x64xf32, #tpu.memory_space<vmem>>, vector<1x64xf32>
    %147 = vector.broadcast %146 : vector<1x64xf32> to vector<8x64xf32>
    %148 = arith.addf %145, %147 : vector<8x64xf32>
    %cst_97 = arith.constant 0.000000e+00 : f32
    %149 = vector.broadcast %cst_97 : f32 to vector<8x64xf32>
    %150 = arith.maximumf %148, %149 : vector<8x64xf32>
    %151 = arith.truncf %150 : vector<8x64xf32> to vector<8x64xbf16>
    %c0_98 = arith.constant 0 : index
    %c0_99 = arith.constant 0 : index
    %152 = vector.load %arg8[%c0_98, %c0_99] : memref<64x128xbf16, #tpu.memory_space<vmem>>, vector<64x128xbf16>
    %cst_100 = arith.constant dense<0.000000e+00> : vector<8x128xf32>
    %153 = tpu.matmul %151, %152, %cst_100 {dimension_numbers = #tpu.dot_dimension_numbers<[1], [0], [0], [1], [0, 0, 1, 1], [], []>} : vector<8x64xbf16>, vector<64x128xbf16>, vector<8x128xf32> -> vector<8x128xf32>
    %c0_101 = arith.constant 0 : index
    %c0_102 = arith.constant 0 : index
    %154 = vector.load %arg9[%c0_101, %c0_102] : memref<1x128xf32, #tpu.memory_space<vmem>>, vector<1x128xf32>
    %155 = vector.broadcast %154 : vector<1x128xf32> to vector<8x128xf32>
    %156 = arith.addf %153, %155 : vector<8x128xf32>
    %cst_103 = arith.constant dense<0xFF800000> : vector<8xf32>
    %157 = vector.multi_reduction <maximumf>, %156, %cst_103 [1] : vector<8x128xf32> to vector<8xf32>
    %158 = vector.shape_cast %157 : vector<8xf32> to vector<8x1xf32>
    %159 = vector.broadcast %158 : vector<8x1xf32> to vector<8x128xf32>
    %160 = arith.subf %156, %159 : vector<8x128xf32>
    %161 = math.exp %160 : vector<8x128xf32>
    %cst_104 = arith.constant dense<0.000000e+00> : vector<8xf32>
    %162 = vector.multi_reduction <add>, %161, %cst_104 [1] : vector<8x128xf32> to vector<8xf32>
    %163 = vector.shape_cast %162 : vector<8xf32> to vector<8x1xf32>
    %164 = vector.broadcast %163 : vector<8x1xf32> to vector<8x128xf32>
    %165 = arith.divf %161, %164 : vector<8x128xf32>
    %c0_105 = arith.constant 0 : index
    %c0_106 = arith.constant 0 : index
    %166 = vector.load %arg10[%c0_105, %c0_106] : memref<8x128xf32, #tpu.memory_space<vmem>>, vector<8x128xf32>
    tpu.vector_store %arg10[%c0_105, %c0_106], %165 {strides = array<i32>} : memref<8x128xf32, #tpu.memory_space<vmem>>, vector<8x128xf32>,
    return
  }
  func.func @transform_0(%arg0: i32) -> (i32, i32) {
    %c0_i32 = arith.constant 0 : i32
    %c0_i32_0 = arith.constant 0 : i32
    return %arg0, %c0_i32 : i32, i32
  }
  func.func @transform_1(%arg0: i32) -> (i32, i32, i32) {
    %c0_i32 = arith.constant 0 : i32
    %c0_i32_0 = arith.constant 0 : i32
    %c0_i32_1 = arith.constant 0 : i32
    %c0_i32_2 = arith.constant 0 : i32
    return %c0_i32, %c0_i32_0, %c0_i32_1 : i32, i32, i32
  }
  func.func @transform_2(%arg0: i32) -> (i32, i32) {
    %c0_i32 = arith.constant 0 : i32
    %c0_i32_0 = arith.constant 0 : i32
    %c0_i32_1 = arith.constant 0 : i32
    return %c0_i32, %c0_i32_0 : i32, i32
  }
  func.func @transform_3(%arg0: i32) -> (i32, i32, i32) {
    %c0_i32 = arith.constant 0 : i32
    %c0_i32_0 = arith.constant 0 : i32
    %c0_i32_1 = arith.constant 0 : i32
    %c0_i32_2 = arith.constant 0 : i32
    return %c0_i32, %c0_i32_0, %c0_i32_1 : i32, i32, i32
  }
  func.func @transform_4(%arg0: i32) -> (i32, i32) {
    %c0_i32 = arith.constant 0 : i32
    %c0_i32_0 = arith.constant 0 : i32
    %c0_i32_1 = arith.constant 0 : i32
    return %c0_i32, %c0_i32_0 : i32, i32
  }
  func.func @transform_5(%arg0: i32) -> (i32, i32, i32) {
    %c0_i32 = arith.constant 0 : i32
    %c0_i32_0 = arith.constant 0 : i32
    %c0_i32_1 = arith.constant 0 : i32
    %c0_i32_2 = arith.constant 0 : i32
    return %c0_i32, %c0_i32_0, %c0_i32_1 : i32, i32, i32
  }
  func.func @transform_6(%arg0: i32) -> (i32, i32) {
    %c0_i32 = arith.constant 0 : i32
    %c0_i32_0 = arith.constant 0 : i32
    %c0_i32_1 = arith.constant 0 : i32
    return %c0_i32, %c0_i32_0 : i32, i32
  }
  func.func @transform_7(%arg0: i32) -> (i32, i32) {
    %c0_i32 = arith.constant 0 : i32
    %c0_i32_0 = arith.constant 0 : i32
    %c0_i32_1 = arith.constant 0 : i32
    return %c0_i32, %c0_i32_0 : i32, i32
  }
  func.func @transform_8(%arg0: i32) -> (i32, i32) {
    %c0_i32 = arith.constant 0 : i32
    %c0_i32_0 = arith.constant 0 : i32
    %c0_i32_1 = arith.constant 0 : i32
    return %c0_i32, %c0_i32_0 : i32, i32
  }
  func.func @transform_9(%arg0: i32) -> (i32, i32) {
    %c0_i32 = arith.constant 0 : i32
    %c0_i32_0 = arith.constant 0 : i32
    return %arg0, %c0_i32 : i32, i32
  }
}

</mosaic_0001>

<bundles_post_ra>
// kernel: tpu_custom_call.1
= control target key start
LH: loop header
LB: loop body
LE: loop exit
PB: predicated region body
PF: predicated region fallthrough
CT: control target
= control target key end

     0   :  { %14 = vsyncpa [#allocation7], 0  ;;  %s2561_s0 = inlined_call_operand.vmem [shape: bf16[128,4], index: 0, kind: input, shape index: {}]   ;;  %s2562_s1 = inlined_call_operand.vmem [shape: bf16[3,4,16], index: 1, kind: input, shape index: {}]   ;;  %s2563_s2 = inlined_call_operand.vmem [shape: f32[1,16], index: 2, kind: input, shape index: {}]   ;;  %s2564_s3 = inlined_call_operand.hbm [shape: bf16[3,16,32], index: 3, kind: input, shape index: {}]   ;;  %s2565_s4 = inlined_call_operand.vmem [shape: f32[1,32], index: 4, kind: input, shape index: {}]   ;;  %s2566_s5 = inlined_call_operand.vmem [shape: bf16[4,32,64], index: 5, kind: input, shape index: {}]   ;;  %s2567_s6 = inlined_call_operand.vmem [shape: f32[1,64], index: 6, kind: input, shape index: {}]   ;;  %s2568_s7 = inlined_call_operand.hbm [shape: bf16[64,128], index: 7, kind: input, shape index: {}]   ;;  %s2569_s8 = inlined_call_operand.vmem [shape: f32[1,128], index: 8, kind: input, shape index: {}]   ;;  %s2570_s9 = inlined_call_operand.hbm [shape: f32[16,128], index: 9, kind: output, shape index: {}]  }
   0x1   :  { %15 = vsyncpa [#allocation10], 0 }
   0x2   :  { %16 = vsyncpa [#allocation8], 0 }
   0x3   :  { %18 = vsyncpa [#allocation8 + $0x1], 0  ;;  %s2181_s30 = smov 0   ;;  %s2183_s10 = smov 0  }
   0x4   :  { %s2185_s11 = smov 0   ;;  %s2187_s12 = smov 0  }
   0x5 LB: > { %2577 = sst [smem:[#allocation15_spill]] %s2118_s11  ;;  %s2202_s13 = sadd.s32 4294967295, %s2122_s12   ;;  %s2122_s12 = sphi %s2187_s12, %s2605_s12   ;;  %s2118_s11 = sphi %s2185_s11, %s2607_s11   ;;  %s2114_s10 = sphi %s2183_s10, %s2609_s10   ;;  %s2110_s30 = sphi %s2181_s30, %s2608_s30  }
   0x6   : > { %s1674_s14 = sadd.s32 4294967294, %s2122_s12   ;;  %s2206_s15 = sadd.s32 1, %s2122_s12  }
   0x7   : > { %2578 = sst [smem:[#allocation16_spill]] %s2206_s15  ;;  %s225_s16 = sadd.s32 1, %s2118_s11 }
   0x8   : > { %s222_s17 = ssub.s32 %s2122_s12, %s2206_s15  ;;  %p235_p0 = scmp.ne.s32.totalorder %s2118_s11, %s2114_s10 }
   0x9   : > { %p223_p1 = scmp.eq.s32.totalorder %s222_s17, 0  ;;  %p236_p2 = scmp.eq.s32.totalorder %s2202_s13, 1 }
   0xa   : > { %p241_p3 = scmp.ne.s32.totalorder %s2114_s10, %s2110_s30  ;;  %p242_p4 = scmp.eq.s32.totalorder %s1674_s14, 1 }
   0xb   : > { %s2217_s18 = scalar_select %p223_p1, %s2118_s11, %s225_s16  }
   0xc   : > { %p2219_p5 = por %p236_p2, %p235_p0  ;;  %p2223_p6 = por %p242_p4, %p241_p3 }
   0xd   : > { %2579 = sst [smem:[#allocation17_spill]] %s2217_s18  ;;  %p1675_p7 = scmp.ge.s32.totalorder %s2122_s12, 1 }
   0xe   : > { %s2580_s19 = scalar_select %p2219_p5, 1, 0 }
   0xf   : > { %s2581_s20 = scalar_select %p2223_p6, 1, 0 }
  0x10   : > { %p249_p8 = scmp.lt.s32.totalorder %s2122_s12, 3  ;;  %p2571_p9 = scmp.eq.s32.totalorder %s2202_s13, 0 }
  0x11   : > { %s2124_s22 = smov [#allocation6]   ;;  %s2125_s25 = smov [#allocation9]  }
  0x12   : > { %p2230_p10 = pnand %p1675_p7, %p249_p8  ;;  %s267_s23 = sshll.u32 %s2124_s22, 4  ;;  %s268_s23 = int_to_ptr.vmem [resolvable:$true] %s267_s23 }
  0x13   : > { %s289_s26 = sshll.u32 %s2125_s25, 4  ;;  %s1996_s29 = scalar_lea.hbm %s2564_s3, 384  ;;  %s2242_s26 = int_to_ptr.vmem [resolvable:$true] %s289_s26 }
  0x14   : > { %s2582_s21 = scalar_select %p2230_p10, 1, 0 }
  0x15   : > { %p1919_p11 = pneg %p2230_p10  ;;  %p1997_p13 = scmp.ne.s32.totalorder %s2564_s3, %s1996_s29 }
  0x16   : > { %p2003_p3 = scmp.lt.u32.totalorder %s1996_s29, %s2564_s3 }
  0x17   : > { %p2238_p12 = pnand %p2571_p9, %p1919_p11 }
  0x19   : > { %p1998_p0 = pneg %p2238_p12 }
  0x1b   : > { %p1999_p1 = pnand %p1998_p0, %p1997_p13 }
  0x1d   : > { %p2000_p2 = pneg %p1999_p1 }
  0x1f   : > { %p2005_p4 = pnand %p2003_p3, %p2000_p2 }
  0x21   : > { %2008 = shalt.err (!%p2005_p4)
}
  0x22   : > { %s2009_s25 = scalar_lea.vmem %s268_s23, 384  ;;  %p2017_p9 = scmp.lt.s32.totalorder %s268_s23, %s268_s23 }
  0x23   : > { %p2010_p7 = scmp.ne.s32.totalorder %s268_s23, %s2009_s25  ;;  %p2018_p6 = scmp.lt.s32.totalorder %s2009_s25, %s2009_s25 }
  0x25   : > { %p2012_p8 = pnand %p2010_p7, %p1998_p0  ;;  %p2019_p5 = por %p2018_p6, %p2017_p9 }
  0x27   : > { %p2013_p11 = pneg %p2012_p8 }
  0x29   : > { %p2020_p10 = pnand %p2019_p5, %p2013_p11 }
  0x2b   : > { %2023 = shalt.err (!%p2020_p10)
}
  0x2c   : > { %s2126_s27 = smov 64   ;;  %s2127_s28 = smov 4  }
  0x2d   : > { %1922 = dma.hbm_to_vmem [thread:$0]  (!%p2238_p12), %s2564_s3, 384, %s268_s23, [#allocation7], %s2126_s27, %s2126_s27, %s2127_s28  }
  0x2e   : > { %s2024_s22 = scalar_lea.hbm %s2568_s7, 512 }
  0x2f   : > { %p2025_p13 = scmp.ne.s32.totalorder %s2568_s7, %s2024_s22  ;;  %p2031_p9 = scmp.lt.u32.totalorder %s2024_s22, %s2568_s7 }
  0x31   : > { %p2027_p5 = pnand %p2025_p13, %p1998_p0 }
  0x33   : > { %p2028_p6 = pneg %p2027_p5 }
  0x35   : > { %p2033_p10 = pnand %p2031_p9, %p2028_p6 }
  0x37   : > { %2036 = shalt.err (!%p2033_p10)
}
  0x38   : > { %s2037_s23 = scalar_lea.vmem %s2242_s26, 512  ;;  %p2045_p4 = scmp.lt.s32.totalorder %s2242_s26, %s2242_s26 }
  0x39   : > { %p2038_p1 = scmp.ne.s32.totalorder %s2242_s26, %s2037_s23  ;;  %p2046_p7 = scmp.lt.s32.totalorder %s2037_s23, %s2037_s23 }
  0x3b   : > { %p2040_p2 = pnand %p2038_p1, %p1998_p0  ;;  %p2047_p8 = por %p2046_p7, %p2045_p4 }
  0x3d   : > { %p2041_p3 = pneg %p2040_p2 }
  0x3f   : > { %p2048_p11 = pnand %p2047_p8, %p2041_p3 }
  0x41   : > { %2051 = shalt.err (!%p2048_p11)
}
  0x42   : > { %1925 = dma.hbm_to_vmem [thread:$0]  (!%p2238_p12), %s2568_s7, 512, %s2242_s26, [#allocation10], %s2126_s27, %s2126_s27, %s2127_s28  }
  0x43   : > { %p2584_p13 = scmp.ne.s32.totalorder %s2582_s21, 0 }
  0x44   : > { %p2585_p5 = scmp.eq.s32.totalorder (!%p2584_p13), %s2202_s13, 0 }
  0x45   : > { %317 = sbr.rel (%p2584_p13) target bundleno = 1391 (0x56f), region = 56 }
  0x4c   : > { %2097 = dma.done.wait (%p2585_p5), [#allocation7], 384   ;;  %p2586_p0 = pmov %p2585_p5 }
  0x4e   : > { %2099 = vsyncadd (%p2586_p0), [#allocation7], 4294966912  ;;  %p2587_p6 = pmov %p2586_p0 }
  0x4f   : > { %p2588_p9 = pmov %p2586_p0 }
  0x50   : > { %2101 = dma.done.wait (%p2587_p6), [#allocation10], 512  }
  0x51   : > { %2103 = vsyncadd (%p2588_p9), [#allocation10], 4294966784  ;;  %s1683_s18 = sshll.u32 %s2202_s13, 3  ;;  %vm380_vm0 = vcmask 31744   ;;  %v391_v0 = vlaneseq  ;;  %v2128_v1 = vmov 0.0   ;;  %vm575_vm1 = vcmask 1041408  }
  0x52   : > { %p358_p12 = scmp.lt.s32.totalorder %s1683_s18, 15  ;;  %381 = vst.msk [vmem:[#allocation2] sm:$0xff] %vm380_vm0, %v2128_v1  ;;  %382 = vst.msk [vmem:[#allocation2 + $0x48] sm:$0xff] %vm380_vm0, %v2128_v1  ;;  %v1685_v8 = vld [vmem:[%s2562_s1 + $0x2] sm:$0x3]  ;;  %s354_s28 = sand.u32 1, %s2114_s10  }
  0x53   : > { %v2306_v2 = vshrl.u32 %v391_v0, 7  ;;  %1906 = vmatprep.subr.msk.bf16.mxu0 %vm575_vm1, %v1685_v8  ;;  %v577_v13 = vsel %vm575_vm1, %v1685_v8, 0  ;;  %v540_v16 = vld [vmem:[%s2562_s1] sm:$0x3]  ;;  %v1698_v26 = vld [vmem:[%s2562_s1 + $0x4] sm:$0x3] }
  0x54   : > { %s2611_s18 = smov (!%p358_p12, %s1683_s18), 15  ;;  %1791 = vmatpush3.bf16.msra.mxu0 %v577_v13  ;;  %v657_v20 = vsel %vm575_vm1, %v540_v16, 0  ;;  %v783_v50 = vsel %vm575_vm1, %v1698_v26, 0  ;;  %s1682_s29 = sshll.u32 %s354_s28, 3 }
  0x55   : > { %v2309_v3 = vadd.s32 8, %v2306_v2  ;;  %s1684_s21 = sshll.u32 %s2611_s18, 2  ;;  %v404_v4 = vand.u32 7, %v2306_v2  ;;  %v2316_v5 = vadd.s32 16, %v2306_v2  ;;  %v2319_v6 = vadd.s32 24, %v2306_v2  ;;  %1907 = vmatprep.subr.msk.bf16.mxu0 %vm575_vm1, %v540_v16  ;;  %s1746_s14 = sshll.u32 %s2202_s13, 7 }
  0x56   : > { %s361_s27 = scalar_lea.vmem %s2561_s0, %s1684_s21  ;;  %v2322_v7 = vadd.s32 32, %v2306_v2  ;;  %v2329_v12 = vadd.s32 40, %v2306_v2  ;;  %v2357_v30 = vadd.s32 48, %v2306_v2  ;;  %v399_v32 = vadd.s32 56, %v2306_v2  ;;  %s356_s16 = scalar_lea.vmem [#allocation11], %s1682_s29 }
  0x57   : > { %v364_v9 = vld [vmem:[%s361_s27] sm:$0xff]   ;;  %v366_v10 = vld [vmem:[%s361_s27 + $0x8] sm:$0xff]   ;;  %v411_v11 = vand.u32 7, %v2309_v3  ;;  %v368_v17 = vld [vmem:[%s361_s27 + $0x10] sm:$0xff]   ;;  %v418_v27 = vand.u32 7, %v2316_v5  ;;  %v425_v28 = vand.u32 7, %v2319_v6  ;;  %s2519_s23 = scalar_lea.hbm %s2570_s9, %s1746_s14 }
  0x58   : > { %v372_v14 = vunpack.c.l.bf16 %v364_v9  ;;  %v373_v15 = vunpack.c.h.bf16 %v364_v9  ;;  %v374_v18 = vunpack.c.l.bf16 %v366_v10  ;;  %v375_v19 = vunpack.c.h.bf16 %v366_v10  ;;  %v370_v21 = vld [vmem:[%s361_s27 + $0x18] sm:$0xff]   ;;  %1792 = vmatprep.mubr.msk.bf16.mxu0 %vm380_vm0, %v364_v9  ;;  %s1593_s17 = sshll.u32 %s356_s16, 4  ;;  %s1580_s11 = scalar_lea.sflag [#allocation8], %s354_s28  ;;  %s2521_s17 = int_to_ptr.vmem [resolvable:$true] %s1593_s17 }
  0x59   : > { %v376_v22 = vunpack.c.l.bf16 %v368_v17  ;;  %v377_v23 = vunpack.c.h.bf16 %v368_v17  ;;  %v378_v24 = vunpack.c.l.bf16 %v370_v21  ;;  %v379_v25 = vunpack.c.h.bf16 %v370_v21  ;;  %1793 = vmatmul.mubr.msk.bf16.vlgmr.msra.gmra.mrb[0].mxu0 %vm380_vm0, %v366_v10  ;;  %s2052_s15 = scalar_lea.vmem %s2521_s17, 128  ;;  %p2603_p1 = scmp.ne.s32.totalorder %s2580_s19, 0 }
  0x5a   : > { %383 = vst.msk [vmem:[#allocation2 + $0x8] sm:$0xff] %vm380_vm0, %v372_v14  ;;  %384 = vst.msk [vmem:[#allocation2 + $0x10] sm:$0xff] %vm380_vm0, %v373_v15  ;;  %1801 = vmatpush3.bf16.msra.mxu0 %v657_v20  ;;  %1796 = vmatprep.mubr.msk.bf16.mxu0 %vm380_vm0, %v368_v17  ;;  %v432_v29 = vand.u32 7, %v2322_v7  ;;  %vm504_vm2 = vcmp.ge.s32.totalorder %v404_v4, 1  ;;  %vm505_vm3 = vcmp.ge.s32.totalorder %v411_v11, 1  ;;  %v439_v31 = vand.u32 7, %v2329_v12  ;;  %p2053_p10 = scmp.ne.s32.totalorder %s2521_s17, %s2052_s15 }
  0x5b   : > { %385 = vst.msk [vmem:[#allocation2 + $0x18] sm:$0xff] %vm380_vm0, %v374_v18  ;;  %386 = vst.msk [vmem:[#allocation2 + $0x20] sm:$0xff] %vm380_vm0, %v375_v19  ;;  %1908 = vmatprep.subr.msk.bf16.mxu0 %vm575_vm1, %v1698_v26  ;;  %vm2363_vm4 = vcmp.ge.s32.totalorder %v418_v27, 1  ;;  %vm2367_vm5 = vcmp.ge.s32.totalorder %v425_v28, 1  ;;  %v446_v46 = vand.u32 7, %v2357_v30  ;;  %v453_v47 = vand.u32 7, %v399_v32 }
  0x5c   : > { %387 = vst.msk [vmem:[#allocation2 + $0x28] sm:$0xff] %vm380_vm0, %v376_v22  ;;  %388 = vst.msk [vmem:[#allocation2 + $0x30] sm:$0xff] %vm380_vm0, %v377_v23  ;;  %vm2371_vm6 = vcmp.ge.s32.totalorder %v432_v29, 1  ;;  %vm2375_vm7 = vcmp.ge.s32.totalorder %v439_v31, 1  ;;  %vm2393_vm8 = vcmp.lt.s32.totalorder %v404_v4, 7  ;;  %vm2397_vm9 = vcmp.lt.s32.totalorder %v411_v11, 7  ;;  %p2054_p2 = pnand %p2053_p10, %p2603_p1 }
  0x5d   : > { %389 = vst.msk [vmem:[#allocation2 + $0x38] sm:$0xff] %vm380_vm0, %v378_v24  ;;  %390 = vst.msk [vmem:[#allocation2 + $0x40] sm:$0xff] %vm380_vm0, %v379_v25  ;;  %vm2401_vm10 = vcmp.ge.s32.totalorder %v446_v46, 1  ;;  %vm511_vm11 = vcmp.ge.s32.totalorder %v453_v47, 1  ;;  %vm734_vm12 = vcmp.lt.s32.totalorder %v418_v27, 7  ;;  %vm735_vm13 = vcmp.lt.s32.totalorder %v425_v28, 7 }
  0x5e   : > { %vm736_vm14 = vcmp.lt.s32.totalorder %v432_v29, 7  ;;  %vm737_vm15 = vcmp.lt.s32.totalorder %v439_v31, 7  ;;  %vm738_vm1 = vcmp.lt.s32.totalorder %v446_v46, 7  ;;  %v1973_v24 = vld [vmem:[#allocation6 + $0x8] sm:$0xff]   ;;  %v2423_v25 = vld [vmem:[#allocation6] sm:$0xff]   ;;  %p2055_p3 = pneg %p2054_p2  ;;  %s2130_s13 = smov [#allocation11]  }
  0x5f   : > { %1820 = vmatprep.subr.bf16.mxu1 %v1973_v24  ;;  %v1703_v26 = vld [vmem:[%s2563_s2] ss:$0 sm:$0xff]  ;;  %s2056_s18 = sshll.u32 %s2130_s13, 4  ;;  %s2057_s18 = int_to_ptr.vmem [resolvable:$false] %s2056_s18 }
  0x60   : > { %1821 = vmatpush3.bf16.msra.mxu1 %v1973_v24  ;;  %s2058_s21 = scalar_lea.vmem %s2057_s18, 256  ;;  %p2059_p4 = scmp.lt.s32.totalorder %s2521_s17, %s2057_s18 }
  0x61   : > { %v496_v33 = vld [vmem:[#allocation2 + $0x7] sm:$0xff]  ;;  %v497_v34 = vld [vmem:[#allocation2 + $0xf] sm:$0xff]  ;;  %1797 = vmatmul.mubr.msk.bf16.gmra.mrb[4].mxu0 %vm380_vm0, %v370_v21  ;;  %1826 = vmatprep.subr.bf16.mxu1 %v2423_v25  ;;  %p2060_p7 = scmp.lt.s32.totalorder %s2058_s21, %s2052_s15 }
  0x62   : > { %v528_v36 = vsel %vm504_vm2, %v496_v33, 0.0  ;;  %v529_v37 = vsel %vm505_vm3, %v497_v34, 0.0  ;;  %v498_v38 = vld [vmem:[#allocation2 + $0x17] sm:$0xff]  ;;  %v499_v39 = vld [vmem:[#allocation2 + $0x1f] sm:$0xff]  ;;  %v724_v60 = vld [vmem:[#allocation2 + $0x9] sm:$0xff]  ;;  %vm739_vm2 = vcmp.lt.s32.totalorder %v453_v47, 7 }
  0x63   : > { %v536_v42 = vpack.c.bf16 %v529_v37, %v528_v36  ;;  %v500_v43 = vld [vmem:[#allocation2 + $0x27] sm:$0xff]  ;;  %v501_v44 = vld [vmem:[#allocation2 + $0x2f] sm:$0xff]  ;;  %v530_v48 = vsel %vm2363_vm4, %v498_v38, 0.0  ;;  %v531_v49 = vsel %vm2367_vm5, %v499_v39, 0.0  ;;  %v756_v0 = vsel %vm2393_vm8, %v724_v60, 0.0  ;;  %v726_v9 = vld [vmem:[#allocation2 + $0x19] sm:$0xff]  ;;  %p2061_p8 = por %p2060_p7, %p2059_p4 }
  0x64   : > { %v532_v51 = vsel %vm2371_vm6, %v500_v43, 0.0  ;;  %v533_v52 = vsel %vm2375_vm7, %v501_v44, 0.0  ;;  %v537_v56 = vpack.c.bf16 %v531_v49, %v530_v48  ;;  %v502_v57 = vld [vmem:[#allocation2 + $0x37] sm:$0xff]  ;;  %v503_v58 = vld [vmem:[#allocation2 + $0x3f] sm:$0xff]  ;;  %v728_v11 = vld [vmem:[#allocation2 + $0x29] sm:$0xff]  ;;  %v758_v13 = vsel %vm734_vm12, %v726_v9, 0.0 }
  0x65   : > { %1802 = vmatprep.mubr.msk.bf16.mxu0 %vm380_vm0, %v536_v42  ;;  %v538_v59 = vpack.c.bf16 %v533_v52, %v532_v51  ;;  %v725_v61 = vld [vmem:[#allocation2 + $0x11] sm:$0xff]  ;;  %v534_v62 = vsel %vm2401_vm10, %v502_v57, 0.0  ;;  %v535_v63 = vsel %vm511_vm11, %v503_v58, 0.0  ;;  %v727_v10 = vld [vmem:[#allocation2 + $0x21] sm:$0xff]  ;;  %v760_v15 = vsel %vm736_vm14, %v728_v11, 0.0  ;;  %v730_v19 = vld [vmem:[#allocation2 + $0x39] sm:$0xff]  ;;  %p2062_p11 = pnand %p2061_p8, %p2055_p3 }
  0x66   : > { %v757_v4 = vsel %vm2397_vm9, %v725_v61, 0.0  ;;  %v539_v7 = vpack.c.bf16 %v535_v63, %v534_v62  ;;  %v729_v12 = vld [vmem:[#allocation2 + $0x31] sm:$0xff]  ;;  %v759_v14 = vsel %vm735_vm13, %v727_v10, 0.0  ;;  %v731_v20 = vld [vmem:[#allocation2 + $0x41] sm:$0xff]  ;;  %v762_v21 = vsel %vm738_vm1, %v730_v19, 0.0 }
  0x67   : > { %v764_v8 = vpack.c.bf16 %v757_v4, %v756_v0  ;;  %v761_v16 = vsel %vm737_vm15, %v729_v12, 0.0  ;;  %v765_v17 = vpack.c.bf16 %v759_v14, %v758_v13  ;;  %v763_v22 = vsel %vm739_vm2, %v731_v20, 0.0 }
  0x68   : > { %v766_v18 = vpack.c.bf16 %v761_v16, %v760_v15  ;;  %v767_v23 = vpack.c.bf16 %v763_v22, %v762_v21  ;;  %vm881_vm3 = vcmask 130048   ;;  %v919_v58 = vand.u32 3, %v2306_v2 }
  0x69   : > { %1803 = vmatmul.mubr.msk.bf16.vlgmr.msra.gmra.mrb[0].mxu0 %vm380_vm0, %v537_v56  ;;  %909 = vst.msk [vmem:[#allocation4] sm:$0xff] %vm881_vm3, %v2128_v1  ;;  %910 = vst.msk [vmem:[#allocation4 + $0x28] sm:$0xff] %vm881_vm3, %v2128_v1  ;;  %v933_v12 = vand.u32 3, %v2316_v5  ;;  %v940_v13 = vand.u32 3, %v2319_v6  ;;  %vm2129_vm11 = vmmov 0   ;;  %vm1219_vm12 = vcmask 261120  }
  0x6a   : > { %1811 = vmatpush3.bf16.msra.mxu0 %v783_v50  ;;  %1806 = vmatprep.mubr.msk.bf16.mxu0 %vm380_vm0, %v538_v59  ;;  %v926_v59 = vand.u32 3, %v2309_v3  ;;  %v1975_v3 = vld [vmem:[#allocation6 + $0x10] sm:$0xff]   ;;  %vm1118_vm8 = vcmp.lt.s32.totalorder %v919_v58, 3  ;;  %vm1525_vm13 = vcmask 523264  }
  0x6b   : > { %1862 = vmatprep.subr.bf16.mxu0 %v2128_v1  ;;  %vm969_vm5 = vcmp.ge.s32.totalorder %v933_v12, 1  ;;  %vm970_vm6 = vcmp.ge.s32.totalorder %v940_v13, 1  ;;  %vm1120_vm9 = vcmp.lt.s32.totalorder %v933_v12, 3  ;;  %vm1121_vm10 = vcmp.lt.s32.totalorder %v940_v13, 3 }
  0x6c   : > { %vm968_vm4 = vcmp.ge.s32.totalorder %v926_v59, 1  ;;  %vm1119_vm7 = vcmp.lt.s32.totalorder %v926_v59, 3  ;;  %v1987_v59 = vld [vmem:[#allocation9 + $0x18] sm:$0xff]  }
  0x71   : > { %1807 = vmatmul.mubr.msk.bf16.gmra.mrb[4].mxu0 %vm380_vm0, %v539_v7 }
  0x72   : > { %1812 = vmatprep.mubr.msk.bf16.mxu0 %vm380_vm0, %v764_v8 }
  0x79   : > { %1813 = vmatmul.mubr.msk.bf16.vlgmr.msra.gmra.mrb[0].mxu0 %vm380_vm0, %v765_v17 }
  0x7a   : > { %1816 = vmatprep.mubr.msk.bf16.mxu0 %vm380_vm0, %v766_v18 }
  0x81   : > { %1817 = vmatmul.mubr.msk.bf16.gmra.mrb[4].mxu0 %vm380_vm0, %v767_v23  ;;  %vm967_vm0 = vcmp.ge.s32.totalorder %v919_v58, 1  ;;  %v1986_v58 = vld [vmem:[#allocation9 + $0x10] sm:$0xff]  }
  0x82   : > { %1866 = vmatprep.mubr.msk.bf16.mxu0 %vm2129_vm11, %v2128_v1 }
 0x14c   : > { %v1814_v27 = vpop.f32.mrb[0].mxu0 }
 0x14d   : > { %v867_v28 = vadd.f32 %v1814_v27, %v1703_v26  ;;  %v819_v29 = vpop.f32.mrb[1].mxu0  ;;  %v1976_v27 = vld [vmem:[%s2566_s5 + $0x10] sm:$0xff]  }
 0x14e   : > { %v865_v30 = vadd.f32 %v1703_v26, %v819_v29  ;;  %v1815_v31 = vpop.f32.mrb[2].mxu0  ;;  %v1978_v29 = vld [vmem:[%s2566_s5 + $0x18] sm:$0xff]  }
 0x14f   : > { %v875_v32 = vmax.f32 %v867_v28, 0.0  ;;  %v868_v33 = vadd.f32 %v1815_v31, %v1703_v26  ;;  %v822_v34 = vpop.f32.mrb[3].mxu0  ;;  %v1977_v28 = vld [vmem:[%s2566_s5 + $0x30] sm:$0xff]   ;;  %v1713_v31 = vld [vmem:[%s2565_s4] ss:$0 sm:$0xff] }
 0x150   : > { %v873_v35 = vmax.f32 %v865_v30, 0.0  ;;  %v866_v36 = vadd.f32 %v1703_v26, %v822_v34  ;;  %1863 = vmatpush3.bf16.msra.mxu0 %v1977_v28  ;;  %v1979_v30 = vld [vmem:[%s2566_s5 + $0x38] sm:$0xff]  }
 0x151   : > { %884 = vst.msk [vmem:[#allocation3 + $0x10] sm:$0xff] %vm881_vm3, %v875_v32  ;;  %v876_v37 = vmax.f32 %v868_v33, 0.0  ;;  %1864 = vmatprep.subr.bf16.mxu0 %v2128_v1 }
 0x152   : > { %882 = vst.msk [vmem:[#allocation3] sm:$0xff] %vm881_vm3, %v873_v35  ;;  %v874_v38 = vmax.f32 %v866_v36, 0.0 }
 0x153   : > { %885 = vst.msk [vmem:[#allocation3 + $0x18] sm:$0xff] %vm881_vm3, %v876_v37 }
 0x154   : > { %883 = vst.msk [vmem:[#allocation3 + $0x8] sm:$0xff] %vm881_vm3, %v874_v38  ;;  %v1818_v39 = vpop.f32.mrb[4].mxu0  ;;  %1865 = vmatpush3.bf16.msra.mxu0 %v1979_v30 }
 0x155   : > { %v871_v40 = vadd.f32 %v1818_v39, %v1703_v26  ;;  %v835_v41 = vpop.f32.mrb[5].mxu0 }
 0x156   : > { %v869_v42 = vadd.f32 %v1703_v26, %v835_v41  ;;  %v1819_v43 = vpop.f32.mrb[6].mxu0 }
 0x157   : > { %v879_v44 = vmax.f32 %v871_v40, 0.0  ;;  %v872_v45 = vadd.f32 %v1819_v43, %v1703_v26  ;;  %v838_v46 = vpop.f32.mrb[7].mxu0 }
 0x158   : > { %v877_v47 = vmax.f32 %v869_v42, 0.0  ;;  %v870_v48 = vadd.f32 %v1703_v26, %v838_v46  ;;  %v1980_v46 = vld [vmem:[%s2566_s5] sm:$0xff]  }
 0x159   : > { %888 = vst.msk [vmem:[#allocation3 + $0x30] sm:$0xff] %vm881_vm3, %v879_v44  ;;  %v880_v49 = vmax.f32 %v872_v45, 0.0 }
 0x15a   : > { %886 = vst.msk [vmem:[#allocation3 + $0x20] sm:$0xff] %vm881_vm3, %v877_v47  ;;  %v878_v50 = vmax.f32 %v870_v48, 0.0  ;;  %v892_v51 = vld [vmem:[#allocation3 + $0x10] ss:$2 sm:$0xff]  ;;  %v900_v52 = vld [vmem:[#allocation3 + $0x11] ss:$2 sm:$0xff] }
 0x15b   : > { %889 = vst.msk [vmem:[#allocation3 + $0x38] sm:$0xff] %vm881_vm3, %v880_v49  ;;  %v890_v53 = vld [vmem:[#allocation3] ss:$2 sm:$0xff]  ;;  %v898_v54 = vld [vmem:[#allocation3 + $0x1] ss:$2 sm:$0xff]  ;;  %v906_v55 = vmax.f32 %v892_v51, %v900_v52  ;;  %v1981_v49 = vld [vmem:[%s2566_s5 + $0x8] sm:$0xff]  }
 0x15c   : > { %887 = vst.msk [vmem:[#allocation3 + $0x28] sm:$0xff] %vm881_vm3, %v878_v50  ;;  %v905_v56 = vmax.f32 %v890_v53, %v898_v54  ;;  %v1982_v51 = vld [vmem:[%s2566_s5 + $0x20] sm:$0xff]   ;;  %v1983_v53 = vld [vmem:[%s2566_s5 + $0x28] sm:$0xff]  }
 0x15d   : > { %912 = vst.msk [vmem:[#allocation4 + $0x10] sm:$0xff] %vm881_vm3, %v906_v55 }
 0x15e   : > { %911 = vst.msk [vmem:[#allocation4 + $0x8] sm:$0xff] %vm881_vm3, %v905_v56  ;;  %v987_v57 = vpack.c.bf16 %v906_v55, %v905_v56  ;;  %v1984_v56 = vld [vmem:[#allocation9] sm:$0xff]  }
 0x160   : > { %1822 = vmatprep.mubr.msk.bf16.mxu1 %vm881_vm3, %v987_v57  ;;  %v1985_v57 = vld [vmem:[#allocation9 + $0x8] sm:$0xff]  }
 0x162   : > { %v896_v60 = vld [vmem:[#allocation3 + $0x30] ss:$2 sm:$0xff]  ;;  %v904_v61 = vld [vmem:[#allocation3 + $0x31] ss:$2 sm:$0xff] }
 0x163   : > { %v894_v62 = vld [vmem:[#allocation3 + $0x20] ss:$2 sm:$0xff]  ;;  %v902_v63 = vld [vmem:[#allocation3 + $0x21] ss:$2 sm:$0xff]  ;;  %v908_v0 = vmax.f32 %v896_v60, %v904_v61 }
 0x164   : > { %v907_v4 = vmax.f32 %v894_v62, %v902_v63 }
 0x165   : > { %914 = vst.msk [vmem:[#allocation4 + $0x20] sm:$0xff] %vm881_vm3, %v908_v0  ;;  %v963_v7 = vld [vmem:[#allocation4 + $0x7] sm:$0xff]  ;;  %v964_v8 = vld [vmem:[#allocation4 + $0xf] sm:$0xff] }
 0x166   : > { %913 = vst.msk [vmem:[#allocation4 + $0x18] sm:$0xff] %vm881_vm3, %v907_v4  ;;  %v988_v9 = vpack.c.bf16 %v908_v0, %v907_v4  ;;  %v979_v2 = vsel %vm967_vm0, %v963_v7, 0.0  ;;  %v980_v10 = vsel %vm968_vm4, %v964_v8, 0.0  ;;  %v1114_v19 = vld [vmem:[#allocation4 + $0x9] sm:$0xff] }
 0x167   : > { %v983_v11 = vpack.c.bf16 %v980_v10, %v979_v2  ;;  %v1130_v5 = vsel %vm1118_vm8, %v1114_v19, 0.0 }
 0x168   : > { %1823 = vmatmul.mubr.msk.bf16.vlgmr.msra.gmra.mrb[0].mxu1 %vm881_vm3, %v988_v9 }
 0x169   : > { %1827 = vmatpush3.bf16.msra.mxu1 %v2423_v25  ;;  %1828 = vmatprep.mubr.msk.bf16.mxu1 %vm881_vm3, %v983_v11 }
 0x16a   : > { %1832 = vmatprep.subr.bf16.mxu1 %v1975_v3 }
 0x16c   : > { %v1117_v23 = vld [vmem:[#allocation4 + $0x21] sm:$0xff] }
 0x16d   : > { %v965_v14 = vld [vmem:[#allocation4 + $0x17] sm:$0xff]  ;;  %v966_v15 = vld [vmem:[#allocation4 + $0x1f] sm:$0xff]  ;;  %v1133_v25 = vsel %vm1121_vm10, %v1117_v23, 0.0 }
 0x16e   : > { %v1115_v16 = vld [vmem:[#allocation4 + $0x11] sm:$0xff]  ;;  %v981_v17 = vsel %vm969_vm5, %v965_v14, 0.0  ;;  %v982_v18 = vsel %vm970_vm6, %v966_v15, 0.0  ;;  %v1116_v6 = vld [vmem:[#allocation4 + $0x19] sm:$0xff] }
 0x16f   : > { %v1131_v20 = vsel %vm1119_vm7, %v1115_v16, 0.0  ;;  %v984_v21 = vpack.c.bf16 %v982_v18, %v981_v17  ;;  %v1132_v24 = vsel %vm1120_vm9, %v1116_v6, 0.0 }
 0x170   : > { %v1134_v22 = vpack.c.bf16 %v1131_v20, %v1130_v5  ;;  %v1135_v26 = vpack.c.bf16 %v1133_v25, %v1132_v24 }
 0x174   : > { %1829 = vmatmul.mubr.msk.bf16.vlgmr.msra.gmra.mrb[0].mxu1 %vm881_vm3, %v984_v21  ;;  %v1739_v21 = vld [vmem:[%s2569_s8] ss:$0 sm:$0xff] }
 0x175   : > { %1833 = vmatpush3.bf16.msra.mxu1 %v1975_v3  ;;  %1834 = vmatprep.mubr.msk.bf16.mxu1 %vm881_vm3, %v1134_v22 }
 0x176   : > { %1838 = vmatprep.subr.bf16.mxu1 %v2128_v1 }
 0x180   : > { %1835 = vmatmul.mubr.msk.bf16.vlgmr.msra.gmra.mrb[0].mxu1 %vm881_vm3, %v1135_v26 }
 0x181   : > { %1842 = vmatprep.mubr.msk.bf16.mxu1 %vm2129_vm11, %v2128_v1  ;;  %1839 = vmatpush3.bf16.msra.mxu1 %v1976_v27 }
 0x182   : > { %1840 = vmatprep.subr.bf16.mxu1 %v2128_v1 }
 0x185   : > { %1841 = vmatpush3.bf16.msra.mxu1 %v1978_v29 }
 0x186   : > { %1846 = vmatprep.subr.bf16.mxu1 %v2128_v1 }
 0x253   : > { %v1836_v32 = vpop.f32.mrb[0].mxu1 }
 0x254   : > { %v1213_v33 = vadd.f32 %v1836_v32, %v1713_v31  ;;  %v1185_v34 = vpop.f32.mrb[1].mxu1 }
 0x255   : > { %v1211_v35 = vadd.f32 %v1713_v31, %v1185_v34  ;;  %v1837_v36 = vpop.f32.mrb[2].mxu1 }
 0x256   : > { %v1217_v37 = vmax.f32 %v1213_v33, 0.0  ;;  %v1214_v38 = vadd.f32 %v1837_v36, %v1713_v31  ;;  %v1188_v39 = vpop.f32.mrb[3].mxu1 }
 0x257   : > { %v1215_v40 = vmax.f32 %v1211_v35, 0.0  ;;  %v1212_v41 = vadd.f32 %v1713_v31, %v1188_v39 }
 0x258   : > { %1222 = vst.msk [vmem:[#allocation5 + $0x10] sm:$0xff] %vm1219_vm12, %v1217_v37  ;;  %v1218_v42 = vmax.f32 %v1214_v38, 0.0 }
 0x259   : > { %1220 = vst.msk [vmem:[#allocation5] sm:$0xff] %vm1219_vm12, %v1215_v40  ;;  %v1216_v43 = vmax.f32 %v1212_v41, 0.0 }
 0x25a   : > { %1223 = vst.msk [vmem:[#allocation5 + $0x18] sm:$0xff] %vm1219_vm12, %v1218_v42 }
 0x25b   : > { %1221 = vst.msk [vmem:[#allocation5 + $0x8] sm:$0xff] %vm1219_vm12, %v1216_v43 }
 0x262   : > { %v1231_v44 = vld [vmem:[#allocation5 + $0x1] ss:$4 sm:$0xff]  ;;  %v1413_v45 = vld [vmem:[#allocation5 + $0x3] ss:$4 sm:$0xff]  ;;  %v1224_v50 = vld [vmem:[#allocation5] ss:$4 sm:$0xff] }
 0x263   : > { %v1232_v47 = vpack.c.bf16 %v1231_v44, %v1231_v44  ;;  %v1414_v48 = vpack.c.bf16 %v1413_v45, %v1413_v45  ;;  %v1225_v52 = vpack.c.bf16 %v1224_v50, %v1224_v50  ;;  %v1349_v54 = vld [vmem:[#allocation5 + $0x2] ss:$4 sm:$0xff] }
 0x264   : > { %v1350_v55 = vpack.c.bf16 %v1349_v54, %v1349_v54 }
 0x265   : > { %1843 = vmatmul.mubr.msk.bf16.vlgmr.msra.gmra.mrb[4].mxu1 %vm1219_vm12, %v1232_v47  ;;  %1867 = vmatmul.mubr.msk.bf16.vlgmr.msra.gmra.mrb[8].mxu0 %vm1219_vm12, %v1414_v48 }
 0x266   : > { %1847 = vmatpush3.bf16.msra.mxu1 %v1980_v46  ;;  %1850 = vmatprep.mubr.msk.bf16.mxu1 %vm2129_vm11, %v2128_v1 }
 0x267   : > { %1848 = vmatprep.subr.bf16.mxu1 %v2128_v1 }
 0x26a   : > { %1849 = vmatpush3.bf16.msra.mxu1 %v1981_v49 }
 0x26b   : > { %1854 = vmatprep.subr.bf16.mxu1 %v2128_v1 }
 0x26d   : > { %1851 = vmatmul.mubr.msk.bf16.vlgmr.msra.gmra.mrb[8].mxu1 %vm1219_vm12, %v1225_v52 }
 0x26e   : > { %1855 = vmatpush3.bf16.msra.mxu1 %v1982_v51  ;;  %1858 = vmatprep.mubr.msk.bf16.mxu1 %vm2129_vm11, %v2128_v1 }
 0x26f   : > { %1856 = vmatprep.subr.bf16.mxu1 %v2128_v1 }
 0x272   : > { %1857 = vmatpush3.bf16.msra.mxu1 %v1983_v53 }
 0x273   : > { %1870 = vmatprep.subr.bf16.mxu1 %v2128_v1 }
 0x275   : > { %1859 = vmatmul.mubr.msk.bf16.vlgmr.msra.gmra.mrb[12].mxu1 %vm1219_vm12, %v1350_v55 }
 0x276   : > { %1878 = vmatprep.mubr.msk.bf16.mxu1 %vm2129_vm11, %v2128_v1  ;;  %1871 = vmatpush3.bf16.msra.mxu1 %v1984_v56 }
 0x277   : > { %1872 = vmatprep.subr.bf16.mxu1 %v2128_v1 }
 0x27a   : > { %1873 = vmatpush3.bf16.msra.mxu1 %v1985_v57 }
 0x27b   : > { %1874 = vmatprep.subr.bf16.mxu1 %v2128_v1 }
 0x27e   : > { %1875 = vmatpush3.bf16.msra.mxu1 %v1986_v58 }
 0x27f   : > { %1876 = vmatprep.subr.bf16.mxu1 %v2128_v1  ;;  %v1738_v1 = vld [vmem:[%s2567_s6] ss:$0 sm:$0xff] }
 0x282   : > { %1877 = vmatpush3.bf16.msra.mxu1 %v1987_v59 }
 0x338   : > { %v1287_v60 = vpop.f32.mrb[4].mxu1  ;;  %v1469_v61 = vpop.f32.mrb[8].mxu0 }
 0x339   : > { %v1844_v62 = vpop.f32.mrb[5].mxu1  ;;  %v1868_v63 = vpop.f32.mrb[9].mxu0 }
 0x33a   : > { %v1290_v0 = vpop.f32.mrb[6].mxu1  ;;  %v1472_v4 = vpop.f32.mrb[10].mxu0 }
 0x33b   : > { %v1845_v7 = vpop.f32.mrb[7].mxu1  ;;  %v1869_v8 = vpop.f32.mrb[11].mxu0 }
 0x340   : > { %v1342_v9 = vpop.f32.mrb[8].mxu1 }
 0x341   : > { %v1343_v2 = vadd.f32 %v1342_v9, %v1287_v60  ;;  %v1852_v10 = vpop.f32.mrb[9].mxu1 }
 0x342   : > { %v1345_v3 = vpop.f32.mrb[10].mxu1 }
 0x343   : > { %v1853_v11 = vpop.f32.mrb[11].mxu1 }
 0x348   : > { %v1405_v12 = vpop.f32.mrb[12].mxu1 }
 0x349   : > { %v1411_v13 = vadd.f32 %v1405_v12, %v1343_v2  ;;  %v1860_v14 = vpop.f32.mrb[13].mxu1 }
 0x34a   : > { %v1408_v15 = vpop.f32.mrb[14].mxu1 }
 0x34b   : > { %v1475_v16 = vadd.f32 %v1469_v61, %v1411_v13  ;;  %v1861_v17 = vpop.f32.mrb[15].mxu1 }
 0x34d   : > { %v1483_v18 = vadd.f32 %v1738_v1, %v1475_v16 }
 0x34f   : > { %v1484_v19 = vmax.f32 %v1483_v18, 0.0 }
 0x351   : > { %v1485_v20 = vpack.c.bf16 %v1484_v19, %v1484_v19 }
 0x353   : > { %1879 = vmatmul.mubr.msk.bf16.vlgmr.msra.gmra.mrb[16].mxu1 %vm1525_vm13, %v1485_v20 }
 0x426   : > { %v1563_v5 = vpop.f32.mrb[16].mxu1 }
 0x427   : > { %v1564_v22 = vadd.f32 %v1739_v21, %v1563_v5  ;;  %v1880_v6 = vpop.f32.mrb[17].mxu1 }
 0x428   : > { %v1566_v23 = vpop.f32.mrb[18].mxu1 }
 0x429   : > { %1569 = vmax.xlane.f32.xlu0 %v1564_v22  ;;  %v1881_v24 = vpop.f32.mrb[19].mxu1 }
 0x4b6   : > { %v1570_v25 = vpop.xlane.xlu0 %1569 }
 0x4b7   : > { %v1571_v26 = vsub.f32 %v1564_v22, %v1570_v25 }
 0x4b9   : > { %v1572_v27 = vmul.f32 1.442695, %v1571_v26 }
 0x4bb   : > { %1992 = vpow2.f32 %v1572_v27 }
 0x4c5   : > { %v1993_v28 = vpop.eup %1992 }
 0x4c6   : > { %1574 = vadd.xlane.f32.xlu0 %v1993_v28 }
 0x553   : > { %v1575_v29 = vpop.xlane.xlu0 %1574 }
 0x554   : > { %1994 = vrcp.f32 %v1575_v29 }
 0x55e   : > { %v1995_v30 = vpop.eup %1994 }
 0x55f   : > { %v1577_v31 = vmul.f32 %v1995_v30, %v1993_v28 }
 0x561   : > { %1578 = vst [vmem:[%s356_s16] sm:$0xff] %v1577_v31 }
 0x562   : > { %2065 = shalt.err (!%p2062_p11)
}
 0x563   : > { %s2066_s24 = scalar_lea.hbm %s2519_s23, 128  ;;  %s2070_s28 = scalar_lea.hbm %s2570_s9, 256 }
 0x564   : > { %p2067_p13 = scmp.ne.s32.totalorder %s2519_s23, %s2066_s24  ;;  %p2071_p6 = scmp.lt.u32.totalorder %s2519_s23, %s2570_s9 }
 0x565   : > { %p2072_p9 = scmp.lt.u32.totalorder %s2070_s28, %s2066_s24  ;;  %p2074_p10 = scmp.lt.u32.totalorder %s2066_s24, %s2519_s23 }
 0x566   : > { %p2068_p5 = pnand %p2067_p13, %p2603_p1 }
 0x567   : > { %p2073_p12 = por %p2072_p9, %p2071_p6 }
 0x568   : > { %p2069_p0 = pneg %p2068_p5 }
 0x569   : > { %p2075_p2 = por %p2074_p10, %p2073_p12 }
 0x56b   : > { %p2076_p3 = pnand %p2075_p2, %p2069_p0 }
 0x56d   : > { %2079 = shalt.err (!%p2076_p3)
}
 0x56e   : > { %1917 = dma.vmem_to_hbm [thread:$0]  (%p2603_p1), %s2521_s17, 128, %s2519_s23, %s1580_s11  }
 0x56f PF: > { %p1934_p4 = scmp.ge.s32.totalorder %s2122_s12, 2  ;;  %s1605_s16 = sand.u32 1, %s2110_s30  }
 0x570   : > { %p2604_p7 = scmp.ne.s32.totalorder %s2581_s20, 0  ;;  %s1606_s22 = scalar_lea.sflag [#allocation8], %s1605_s16 }
 0x572   : > { %p1927_p8 = pnand %p1934_p4, %p2604_p7 }
 0x574   : > { %2105 = dma.done.wait (!%p1927_p8), %s1606_s22, 128  }
 0x575   : > { %2107 = vsyncadd (!%p1927_p8), %s1606_s22, 4294967168  ;;  %s2605_s12 = sld [smem:[#allocation16_spill]]  ;;  %s2606_s25 = sld [smem:[#allocation15_spill]] }
 0x576   : > { %s2607_s11 = sld [smem:[#allocation17_spill]]  ;;  %s2608_s30 = smov %s2114_s10 }
 0x57b   : > { %p21_p11 = scmp.ge.s32.totalorder %s2605_s12, 4   ;;  %s2609_s10 = smov %s2606_s25 }
 0x57d   :  { %23 = sbr.rel (!%p21_p11) target bundleno = 5 (0x5), region = 117 }
 0x584   :  { %1611 = vsyncpa [#allocation7], 1 }
 0x585   :  { %1613 = vsyncpa [#allocation7 + $0x1], 1 }
 0x586   :  { %1614 = vsyncpa [#allocation10], 1 }
 0x587   :  { %1615 = vsyncpa [#allocation8], 1 }
 0x588   :  { %1617 = vsyncpa [#allocation8 + $0x1], 1 }

</bundles_post_ra>
